<compile_context>
chip_gen: v6e
topology: v6e:2x2x1
jax: 0.10.0
libtpu: 0.0.40
codegen_flags: <defaults>
</compile_context>

<pallas_src>
import jax
import jax.numpy as jnp
from jax.experimental import pallas as pl
from jax.experimental.pallas import tpu as pltpu


def decoder_kernel(xf_ref, ht_ref, wg_xf_ref, wg_ht_ref, bg_ref,
                   wxf_bd_ref, wloc_ref, bl_ref, mask_ref, y_ref):
    """One batch tile of the MQRNN Decoder forward.

    xf_ref     : (tb, T*F)         flattened future covariates
    ht_ref     : (tb, H)           encoder hidden state
    wg_xf_ref  : (T*F, (T+1)*D)    xf rows of the global MLP weight
    wg_ht_ref  : (H, (T+1)*D)      per-horizon-summed ht rows of the global weight
    bg_ref     : (1, (T+1)*D)      global MLP bias
    wxf_bd_ref : (T*F, T*O)        BlockDiag_T(Wl_xf)
    wloc_ref   : ((T+1)*D, T*O)    [BlockDiag_T(Wl_ci) ; tile(Wl_ca, T)]
    bl_ref     : (1, T*O)          tiled local MLP bias
    mask_ref   : (1, (T+1)*D)      1.0 where ReLU applies (first T*D cols), 0.0 for ca
    y_ref      : (tb, T*O)         output
    """
    xf = xf_ref[...]
    ht = ht_ref[...]

    # Global MLP (ht weight rows pre-summed; K reduced from T*(F+H) to T*F + H).
    contexts = (jnp.dot(xf, wg_xf_ref[...], preferred_element_type=jnp.float32)
                + jnp.dot(ht, wg_ht_ref[...], preferred_element_type=jnp.float32)
                + bg_ref[...])                                   # (tb, (T+1)*D)

    # ReLU on the first T*D columns only (ca, the last D columns, skips ReLU).
    act = jnp.where(mask_ref[...] > 0.5,
                    jnp.maximum(contexts, 0.0), contexts)        # (tb, (T+1)*D)

    # Local MLP collapsed over all T horizons via block-diagonal weights.
    y = (jnp.dot(xf, wxf_bd_ref[...], preferred_element_type=jnp.float32)
         + jnp.dot(act, wloc_ref[...], preferred_element_type=jnp.float32)
         + bl_ref[...])                                          # (tb, T*O)
    y_ref[...] = y.astype(y_ref.dtype)


def init_decoder_params(key, input_size, output_horizon, encoder_hidden_size,
                        decoder_hidden_size, output_size):
    """Deterministic synthetic init (PyTorch Linear-style uniform bounds)."""
    T, F, H, D, O = (output_horizon, input_size, encoder_hidden_size,
                     decoder_hidden_size, output_size)
    k1, k2, k3, k4 = jax.random.split(key, 4)
    g_in, g_out = T * (H + F), (T + 1) * D
    l_in, l_out = 2 * D + F, O
    gb = 1.0 / jnp.sqrt(g_in)
    lb = 1.0 / jnp.sqrt(l_in)
    return {
        "wg": jax.random.uniform(k1, (g_in, g_out), jnp.float32, -gb, gb),
        "bg": jax.random.uniform(k2, (1, g_out), jnp.float32, -gb, gb),
        "wl": jax.random.uniform(k3, (l_in, l_out), jnp.float32, -lb, lb),
        "bl": jax.random.uniform(k4, (1, l_out), jnp.float32, -lb, lb),
        "decoder_hidden_size": D,
    }


def prepare_decoder_params(params, T, F, H, D, O):
    """One-time (init-time) weight rearrangement so the kernel never slices
    on sublane/lane-misaligned boundaries."""
    # Global MLP: split Wg rows into xf-rows (gathered) and ht-rows (summed
    # over horizons, since ht is identical for every horizon).
    wg = params["wg"]                                   # (T*(F+H), (T+1)*D)
    wg3 = wg.reshape(T, F + H, (T + 1) * D)
    wg_xf = wg3[:, :F, :].reshape(T * F, (T + 1) * D)   # (T*F, (T+1)*D)
    wg_ht = wg3[:, F:, :].sum(axis=0)                   # (H, (T+1)*D)

    # Local MLP: block-diagonalize the xf / ci blocks over horizons, tile the
    # shared ca block and bias across horizons.
    wl = params["wl"]                                   # (F+2D, O)
    wl_xf, wl_ci, wl_ca = wl[:F, :], wl[F:F + D, :], wl[F + D:, :]
    eye_t = jnp.eye(T, dtype=wl.dtype)
    wxf_bd = jnp.kron(eye_t, wl_xf)                     # (T*F, T*O)
    wci_bd = jnp.kron(eye_t, wl_ci)                     # (T*D, T*O)
    wloc = jnp.concatenate([wci_bd, jnp.tile(wl_ca, (1, T))], axis=0)  # ((T+1)*D, T*O)
    bl_tiled = jnp.tile(params["bl"], (1, T))           # (1, T*O)

    # ReLU mask: 1.0 over the first T*D context columns, 0.0 over ca.
    relu_mask = jnp.concatenate(
        [jnp.ones((1, T * D), jnp.float32), jnp.zeros((1, D), jnp.float32)],
        axis=1)                                         # (1, (T+1)*D)

    return {
        "wg_xf": wg_xf, "wg_ht": wg_ht, "bg": params["bg"],
        "wxf_bd": wxf_bd, "wloc": wloc, "bl_tiled": bl_tiled,
        "relu_mask": relu_mask,
        "T": T, "F": F, "H": H, "D": D, "O": O,
    }


def decoder_forward(ht, xf, prep, *, batch_tile=256):
    """Glue: flatten xf, run the Pallas kernel over a (possibly tiled) batch."""
    B, T, F = xf.shape
    H = ht.shape[1]
    D, O = prep["D"], prep["O"]

    xf_flat = xf.reshape(B, T * F)

    # Batch tile: full batch for small B; otherwise sublane-aligned tiles so
    # large-B workloads get a "parallel" grid axis (megacore on v7x).
    tb = B if B <= batch_tile else batch_tile
    if tb != B and tb % 8 != 0:
        tb = B
    grid = (pl.cdiv(B, tb),)

    rows = lambda i: (i, 0)     # batch-tiled arrays
    whole = lambda i: (0, 0)    # weights: constant block -> stay VMEM-resident

    y_flat = pl.pallas_call(
        decoder_kernel,
        out_shape=jax.ShapeDtypeStruct((B, T * O), jnp.float32),
        grid=grid,
        in_specs=[
            pl.BlockSpec((tb, T * F), rows),                    # xf_flat
            pl.BlockSpec((tb, H), rows),                        # ht
            pl.BlockSpec((T * F, (T + 1) * D), whole),          # wg_xf
            pl.BlockSpec((H, (T + 1) * D), whole),              # wg_ht
            pl.BlockSpec((1, (T + 1) * D), whole),              # bg
            pl.BlockSpec((T * F, T * O), whole),                # wxf_bd
            pl.BlockSpec(((T + 1) * D, T * O), whole),          # wloc
            pl.BlockSpec((1, T * O), whole),                    # bl_tiled
            pl.BlockSpec((1, (T + 1) * D), whole),              # relu_mask
        ],
        out_specs=pl.BlockSpec((tb, T * O), rows),
        compiler_params=pltpu.CompilerParams(
            dimension_semantics=("parallel",)),
    )(xf_flat, ht, prep["wg_xf"], prep["wg_ht"], prep["bg"],
      prep["wxf_bd"], prep["wloc"], prep["bl_tiled"], prep["relu_mask"])

    return y_flat.reshape(B, T, O)


def decoder_reference(ht, xf, params):
    """Pure-JAX mirror of the PyTorch forward, for verification."""
    B, T, F = xf.shape
    _, H = ht.shape
    D = params["decoder_hidden_size"]
    ht_e = jnp.broadcast_to(ht[:, None, :], (B, T, H))
    inp = jnp.concatenate([xf, ht_e], axis=2).reshape(B, -1)
    contexts = inp @ params["wg"] + params["bg"]
    contexts = contexts.reshape(B, T + 1, D)
    ca = contexts[:, -1, :]
    C = jax.nn.relu(contexts[:, :-1, :])
    ys = []
    for i in range(T):
        loc = jnp.concatenate([xf[:, i, :], C[:, i, :], ca], axis=1)
        ys.append((loc @ params["wl"] + params["bl"])[:, None, :])
    return jnp.concatenate(ys, axis=1)


if __name__ == "__main__":
    # Small, module-consistent shapes.
    B = 2               # num_ts
    F = 4               # input_size (num_features)
    T = 8               # output_horizon
    H = 32              # encoder_hidden_size
    D = 16              # decoder_hidden_size
    O = 3               # output_size (e.g. number of quantiles)

    key = jax.random.PRNGKey(0)
    kp, kh, kx = jax.random.split(key, 3)
    params = init_decoder_params(kp, F, T, H, D, O)
    prep = prepare_decoder_params(params, T, F, H, D, O)   # init-time, not per-call
    ht = jax.random.normal(kh, (B, H), jnp.float32)
    xf = jax.random.normal(kx, (B, T, F), jnp.float32)

    y = decoder_forward(ht, xf, prep)
    y = jax.block_until_ready(y)

    y_ref = decoder_reference(ht, xf, params)
    assert y.shape == (B, T, O), y.shape
    # Tolerance allows for the changed f32 summation order of the rearranged
    # (mathematically identical) weights.
    assert jnp.allclose(y, y_ref, atol=1e-4, rtol=1e-4), (
        f"max abs err {jnp.max(jnp.abs(y - y_ref))}")

    print("KERNEL_OK")
</pallas_src>

<mosaic_0001>
module attributes {stable_mosaic.version = 11 : i64} {
  func.func @decoder_kernel(%arg0: i32, %arg1: memref<2x32xf32, #tpu.memory_space<vmem>>, %arg2: memref<2x32xf32, #tpu.memory_space<vmem>>, %arg3: memref<32x144xf32, #tpu.memory_space<vmem>>, %arg4: memref<32x144xf32, #tpu.memory_space<vmem>>, %arg5: memref<1x144xf32, #tpu.memory_space<vmem>>, %arg6: memref<32x24xf32, #tpu.memory_space<vmem>>, %arg7: memref<144x24xf32, #tpu.memory_space<vmem>>, %arg8: memref<1x24xf32, #tpu.memory_space<vmem>>, %arg9: memref<1x144xf32, #tpu.memory_space<vmem>>, %arg10: memref<2x24xf32, #tpu.memory_space<vmem>>) attributes {dimension_semantics = [#tpu.dimension_semantics<parallel>], iteration_bounds = array<i64: 1>, scalar_prefetch = 0 : i64, scratch_operands = 0 : i64, tpu.core_type = #tpu.core_type<tc>, window_params = [{transform_indices = @transform_0, window_bounds = array<i64: 2, 32>}, {transform_indices = @transform_1, window_bounds = array<i64: 2, 32>}, {pipeline_mode = #tpu.pipeline_mode<synchronous>, transform_indices = @transform_2, window_bounds = array<i64: 32, 144>}, {pipeline_mode = #tpu.pipeline_mode<synchronous>, transform_indices = @transform_3, window_bounds = array<i64: 32, 144>}, {pipeline_mode = #tpu.pipeline_mode<synchronous>, transform_indices = @transform_4, window_bounds = array<i64: 1, 144>}, {pipeline_mode = #tpu.pipeline_mode<synchronous>, transform_indices = @transform_5, window_bounds = array<i64: 32, 24>}, {pipeline_mode = #tpu.pipeline_mode<synchronous>, transform_indices = @transform_6, window_bounds = array<i64: 144, 24>}, {pipeline_mode = #tpu.pipeline_mode<synchronous>, transform_indices = @transform_7, window_bounds = array<i64: 1, 24>}, {pipeline_mode = #tpu.pipeline_mode<synchronous>, transform_indices = @transform_8, window_bounds = array<i64: 1, 144>}, {transform_indices = @transform_9, window_bounds = array<i64: 2, 24>}]} {
    %c0 = arith.constant 0 : index
    %c0_0 = arith.constant 0 : index
    %0 = vector.load %arg1[%c0, %c0_0] : memref<2x32xf32, #tpu.memory_space<vmem>>, vector<2x32xf32>
    %c0_1 = arith.constant 0 : index
    %c0_2 = arith.constant 0 : index
    %1 = vector.load %arg2[%c0_1, %c0_2] : memref<2x32xf32, #tpu.memory_space<vmem>>, vector<2x32xf32>
    %c0_3 = arith.constant 0 : index
    %c0_4 = arith.constant 0 : index
    %2 = vector.load %arg3[%c0_3, %c0_4] : memref<32x144xf32, #tpu.memory_space<vmem>>, vector<32x144xf32>
    %cst = arith.constant dense<0.000000e+00> : vector<2x144xf32>
    %3 = tpu.matmul %0, %2, %cst {dimension_numbers = #tpu.dot_dimension_numbers<[1], [0], [0], [1], [0, 0, 1, 1], [], []>} : vector<2x32xf32>, vector<32x144xf32>, vector<2x144xf32> -> vector<2x144xf32>
    %c0_5 = arith.constant 0 : index
    %c0_6 = arith.constant 0 : index
    %4 = vector.load %arg4[%c0_5, %c0_6] : memref<32x144xf32, #tpu.memory_space<vmem>>, vector<32x144xf32>
    %cst_7 = arith.constant dense<0.000000e+00> : vector<2x144xf32>
    %5 = tpu.matmul %1, %4, %cst_7 {dimension_numbers = #tpu.dot_dimension_numbers<[1], [0], [0], [1], [0, 0, 1, 1], [], []>} : vector<2x32xf32>, vector<32x144xf32>, vector<2x144xf32> -> vector<2x144xf32>
    %6 = arith.addf %3, %5 : vector<2x144xf32>
    %c0_8 = arith.constant 0 : index
    %c0_9 = arith.constant 0 : index
    %7 = vector.load %arg5[%c0_8, %c0_9] : memref<1x144xf32, #tpu.memory_space<vmem>>, vector<1x144xf32>
    %8 = vector.broadcast %7 : vector<1x144xf32> to vector<2x144xf32>
    %9 = arith.addf %6, %8 : vector<2x144xf32>
    %c0_10 = arith.constant 0 : index
    %c0_11 = arith.constant 0 : index
    %10 = vector.load %arg9[%c0_10, %c0_11] : memref<1x144xf32, #tpu.memory_space<vmem>>, vector<1x144xf32>
    %cst_12 = arith.constant 5.000000e-01 : f32
    %11 = vector.broadcast %cst_12 : f32 to vector<1x144xf32>
    %12 = arith.cmpf ogt, %10, %11 : vector<1x144xf32>
    %cst_13 = arith.constant 0.000000e+00 : f32
    %13 = vector.broadcast %cst_13 : f32 to vector<2x144xf32>
    %14 = arith.maximumf %9, %13 : vector<2x144xf32>
    %15 = vector.shape_cast %12 : vector<1x144xi1> to vector<1x144xi1>
    %16 = vector.broadcast %15 : vector<1x144xi1> to vector<2x144xi1>
    %17 = arith.select %16, %14, %9 : vector<2x144xi1>, vector<2x144xf32>
    %c0_14 = arith.constant 0 : index
    %c0_15 = arith.constant 0 : index
    %18 = vector.load %arg6[%c0_14, %c0_15] : memref<32x24xf32, #tpu.memory_space<vmem>>, vector<32x24xf32>
    %cst_16 = arith.constant dense<0.000000e+00> : vector<2x24xf32>
    %19 = tpu.matmul %0, %18, %cst_16 {dimension_numbers = #tpu.dot_dimension_numbers<[1], [0], [0], [1], [0, 0, 1, 1], [], []>} : vector<2x32xf32>, vector<32x24xf32>, vector<2x24xf32> -> vector<2x24xf32>
    %c0_17 = arith.constant 0 : index
    %c0_18 = arith.constant 0 : index
    %20 = vector.load %arg7[%c0_17, %c0_18] : memref<144x24xf32, #tpu.memory_space<vmem>>, vector<144x24xf32>
    %cst_19 = arith.constant dense<0.000000e+00> : vector<2x24xf32>
    %21 = tpu.matmul %17, %20, %cst_19 {dimension_numbers = #tpu.dot_dimension_numbers<[1], [0], [0], [1], [0, 0, 1, 1], [], []>} : vector<2x144xf32>, vector<144x24xf32>, vector<2x24xf32> -> vector<2x24xf32>
    %22 = arith.addf %19, %21 : vector<2x24xf32>
    %c0_20 = arith.constant 0 : index
    %c0_21 = arith.constant 0 : index
    %23 = vector.load %arg8[%c0_20, %c0_21] : memref<1x24xf32, #tpu.memory_space<vmem>>, vector<1x24xf32>
    %24 = vector.broadcast %23 : vector<1x24xf32> to vector<2x24xf32>
    %25 = arith.addf %22, %24 : vector<2x24xf32>
    %c0_22 = arith.constant 0 : index
    %c0_23 = arith.constant 0 : index
    %26 = vector.load %arg10[%c0_22, %c0_23] : memref<2x24xf32, #tpu.memory_space<vmem>>, vector<2x24xf32>
    tpu.vector_store %arg10[%c0_22, %c0_23], %25 {strides = array<i32>} : memref<2x24xf32, #tpu.memory_space<vmem>>, vector<2x24xf32>,
    return
  }
  func.func @transform_0(%arg0: i32) -> (i32, i32) {
    %c0_i32 = arith.constant 0 : i32
    %c0_i32_0 = arith.constant 0 : i32
    return %arg0, %c0_i32 : i32, i32
  }
  func.func @transform_1(%arg0: i32) -> (i32, i32) {
    %c0_i32 = arith.constant 0 : i32
    %c0_i32_0 = arith.constant 0 : i32
    return %arg0, %c0_i32 : i32, i32
  }
  func.func @transform_2(%arg0: i32) -> (i32, i32) {
    %c0_i32 = arith.constant 0 : i32
    %c0_i32_0 = arith.constant 0 : i32
    %c0_i32_1 = arith.constant 0 : i32
    return %c0_i32, %c0_i32_0 : i32, i32
  }
  func.func @transform_3(%arg0: i32) -> (i32, i32) {
    %c0_i32 = arith.constant 0 : i32
    %c0_i32_0 = arith.constant 0 : i32
    %c0_i32_1 = arith.constant 0 : i32
    return %c0_i32, %c0_i32_0 : i32, i32
  }
  func.func @transform_4(%arg0: i32) -> (i32, i32) {
    %c0_i32 = arith.constant 0 : i32
    %c0_i32_0 = arith.constant 0 : i32
    %c0_i32_1 = arith.constant 0 : i32
    return %c0_i32, %c0_i32_0 : i32, i32
  }
  func.func @transform_5(%arg0: i32) -> (i32, i32) {
    %c0_i32 = arith.constant 0 : i32
    %c0_i32_0 = arith.constant 0 : i32
    %c0_i32_1 = arith.constant 0 : i32
    return %c0_i32, %c0_i32_0 : i32, i32
  }
  func.func @transform_6(%arg0: i32) -> (i32, i32) {
    %c0_i32 = arith.constant 0 : i32
    %c0_i32_0 = arith.constant 0 : i32
    %c0_i32_1 = arith.constant 0 : i32
    return %c0_i32, %c0_i32_0 : i32, i32
  }
  func.func @transform_7(%arg0: i32) -> (i32, i32) {
    %c0_i32 = arith.constant 0 : i32
    %c0_i32_0 = arith.constant 0 : i32
    %c0_i32_1 = arith.constant 0 : i32
    return %c0_i32, %c0_i32_0 : i32, i32
  }
  func.func @transform_8(%arg0: i32) -> (i32, i32) {
    %c0_i32 = arith.constant 0 : i32
    %c0_i32_0 = arith.constant 0 : i32
    %c0_i32_1 = arith.constant 0 : i32
    return %c0_i32, %c0_i32_0 : i32, i32
  }
  func.func @transform_9(%arg0: i32) -> (i32, i32) {
    %c0_i32 = arith.constant 0 : i32
    %c0_i32_0 = arith.constant 0 : i32
    return %arg0, %c0_i32 : i32, i32
  }
}

</mosaic_0001>

<bundles_post_ra>
// kernel: tpu_custom_call.1
= control target key start
LH: loop header
LB: loop body
LE: loop exit
PB: predicated region body
PF: predicated region fallthrough
CT: control target
= control target key end

     0   :  { %v468_v4 = vmov 0.0   ;;  %vm51_vm0 = vcmask 261120   ;;  %s682_s0 = inlined_call_operand.vmem [shape: f32[2,32], index: 0, kind: input, shape index: {}]   ;;  %s683_s1 = inlined_call_operand.vmem [shape: f32[2,32], index: 1, kind: input, shape index: {}]   ;;  %s684_s2 = inlined_call_operand.vmem [shape: f32[32,144], index: 2, kind: input, shape index: {}]   ;;  %s685_s3 = inlined_call_operand.vmem [shape: f32[32,144], index: 3, kind: input, shape index: {}]   ;;  %s686_s4 = inlined_call_operand.vmem [shape: f32[1,144], index: 4, kind: input, shape index: {}]   ;;  %s687_s5 = inlined_call_operand.vmem [shape: f32[32,24], index: 5, kind: input, shape index: {}]   ;;  %s688_s6 = inlined_call_operand.vmem [shape: f32[144,24], index: 6, kind: input, shape index: {}]   ;;  %s689_s7 = inlined_call_operand.vmem [shape: f32[1,24], index: 7, kind: input, shape index: {}]   ;;  %s690_s8 = inlined_call_operand.vmem [shape: f32[1,144], index: 8, kind: input, shape index: {}]   ;;  %s691_s9 = inlined_call_operand.hbm [shape: f32[2,24], index: 9, kind: output, shape index: {}]  }
   0x1   :  { %v50_v0 = vld [vmem:[%s685_s3 + $0x38] sm:$0xff]  ;;  %v49_v1 = vld [vmem:[%s685_s3 + $0x30] sm:$0xff]  ;;  %v48_v2 = vld [vmem:[%s685_s3 + $0x28] sm:$0xff]  ;;  %119 = vmatprep.mubr.f32.mxu1 %v468_v4  ;;  %257 = vmatprep.subr.mxu0 %v468_v4 }
   0x2   :  { %79 = vmatprep.subr.mxu1 %v50_v0  ;;  %v47_v3 = vld [vmem:[%s685_s3 + $0x20] sm:$0xff]  ;;  %v46_v5 = vld [vmem:[%s685_s3 + $0x18] sm:$0xff]  ;;  %v45_v6 = vld [vmem:[%s685_s3 + $0x10] sm:$0xff] }
   0x3   :  { %80 = vmatpush1.msra.mxu1 %v49_v1  ;;  %v44_v7 = vld [vmem:[%s685_s3 + $0x8] sm:$0xff]  ;;  %v43_v8 = vld [vmem:[%s685_s3] sm:$0xff]  ;;  %v42_v10 = vld [vmem:[%s684_s2 + $0x38] sm:$0xff] }
   0x4   :  { %81 = vmatprep.subr.mxu1 %v48_v2  ;;  %v34_v9 = vld [vmem:[%s683_s1] sm:$0x3]  ;;  %v250_v11 = vld [vmem:[%s688_s6 + $0x78] sm:$0xff]  ;;  %v41_v12 = vld [vmem:[%s684_s2 + $0x30] sm:$0xff] }
   0x5   :  { %82 = vmatpush1.msra.mxu1 %v47_v3  ;;  %258 = vmatpush1.msra.mxu0 %v250_v11  ;;  %v40_v13 = vld [vmem:[%s684_s2 + $0x28] sm:$0xff]  ;;  %v249_v14 = vld [vmem:[%s688_s6 + $0x70] sm:$0xff] }
   0x6   :  { %83 = vmatprep.subr.mxu1 %v46_v5  ;;  %259 = vmatprep.subr.mxu0 %v468_v4 }
   0x7   :  { %84 = vmatpush1.msra.mxu1 %v45_v6 }
   0x8   :  { %85 = vmatprep.subr.mxu1 %v44_v7 }
   0x9   :  { %86 = vmatpush1.msra.mxu1 %v43_v8 }
   0xa   :  { %14 = vsyncpa [#allocation3], 0  ;;  %421 = vmatmul.mubr.msk.f32.vlgmr.msra.gmra.mxu1 %vm51_vm0, %v34_v9  ;;  %153 = vmatprep.subr.mxu1 %v42_v10  ;;  %v39_v15 = vld [vmem:[%s684_s2 + $0x20] sm:$0xff]  ;;  %v38_v16 = vld [vmem:[%s684_s2 + $0x18] sm:$0xff]  ;;  %vm469_vm1 = vmmov 0   ;;  %v202_v41 = vlaneseq  ;;  %v470_v51 = vmov 0  }
   0xb   :  { %154 = vmatpush1.msra.mxu1 %v41_v12  ;;  %193 = vmatprep.mubr.f32.mxu1 %v468_v4  ;;  %v248_v17 = vld [vmem:[%s688_s6 + $0x68] sm:$0xff]  ;;  %v37_v18 = vld [vmem:[%s684_s2 + $0x10] sm:$0xff]  ;;  %v247_v20 = vld [vmem:[%s688_s6 + $0x60] sm:$0xff]  ;;  %vm253_vm4 = vcmask 130048   ;;  %s471_s18 = smov [#allocation2]   ;;  %vm405_vm6 = vcmask 189440  }
   0xc   :  { %155 = vmatprep.subr.mxu1 %v40_v13  ;;  %260 = vmatpush1.msra.mxu0 %v249_v14  ;;  %v36_v19 = vld [vmem:[%s684_s2 + $0x8] sm:$0xff]  ;;  %v35_v21 = vld [vmem:[%s684_s2] sm:$0xff]  ;;  %v246_v23 = vld [vmem:[%s688_s6 + $0x58] sm:$0xff]  ;;  %v203_v42 = vshrl.u32 %v202_v41, 7  ;;  %s413_s19 = sshll.u32 %s471_s18, 4  ;;  %s414_s19 = int_to_ptr.vmem [resolvable:$true] %s413_s19 }
   0xd   :  { %156 = vmatpush1.msra.mxu1 %v39_v15  ;;  %261 = vmatprep.subr.mxu0 %v468_v4  ;;  %v33_v22 = vld [vmem:[%s682_s0] sm:$0x3]  ;;  %v245_v24 = vld [vmem:[%s688_s6 + $0x50] sm:$0xff]  ;;  %v244_v25 = vld [vmem:[%s688_s6 + $0x48] sm:$0xff]  ;;  %s446_s20 = scalar_lea.vmem %s414_s19, 32  ;;  %p451_p1 = scmp.lt.s32.totalorder %s414_s19, %s414_s19 }
   0xe   :  { %157 = vmatprep.subr.mxu1 %v38_v16  ;;  %262 = vmatpush1.msra.mxu0 %v248_v17  ;;  %v243_v26 = vld [vmem:[%s688_s6 + $0x40] sm:$0xff]  ;;  %v242_v27 = vld [vmem:[%s688_s6 + $0x38] sm:$0xff]  ;;  %v241_v28 = vld [vmem:[%s688_s6 + $0x30] sm:$0xff]  ;;  %v204_v45 = vsub.s32 0, %v203_v42  ;;  %v208_v47 = vsub.s32 1, %v203_v42  ;;  %p447_p0 = scmp.ne.s32.totalorder %s414_s19, %s446_s20  ;;  %p452_p2 = scmp.lt.s32.totalorder %s446_s20, %s446_s20 }
   0xf   :  { %158 = vmatpush1.msra.mxu1 %v37_v18  ;;  %263 = vmatprep.subr.mxu0 %v468_v4  ;;  %v240_v29 = vld [vmem:[%s688_s6 + $0x28] sm:$0xff]  ;;  %v239_v30 = vld [vmem:[%s688_s6 + $0x20] sm:$0xff]  ;;  %v238_v31 = vld [vmem:[%s688_s6 + $0x18] sm:$0xff] }
  0x10   :  { %159 = vmatprep.subr.mxu1 %v36_v19  ;;  %264 = vmatpush1.msra.mxu0 %v247_v20  ;;  %v237_v32 = vld [vmem:[%s688_s6 + $0x10] sm:$0xff]  ;;  %v234_v33 = vld [vmem:[%s687_s5 + $0x18] sm:$0xff]  ;;  %v236_v34 = vld [vmem:[%s688_s6 + $0x8] sm:$0xff]  ;;  %p453_p3 = por %p452_p2, %p451_p1 }
  0x11   :  { %160 = vmatpush1.msra.mxu1 %v35_v21  ;;  %265 = vmatprep.subr.mxu0 %v468_v4  ;;  %v233_v35 = vld [vmem:[%s687_s5 + $0x10] sm:$0xff]  ;;  %v235_v36 = vld [vmem:[%s688_s6] sm:$0xff]  ;;  %v232_v37 = vld [vmem:[%s687_s5 + $0x8] sm:$0xff] }
  0x12   :  { %422 = vmatmul.mubr.msk.f32.vlgmr.msra.gmra.mxu1 %vm51_vm0, %v33_v22  ;;  %266 = vmatpush1.msra.mxu0 %v246_v23  ;;  %v252_v38 = vld [vmem:[%s688_s6 + $0x88] sm:$0xff]  ;;  %v231_v39 = vld [vmem:[%s687_s5] sm:$0xff]  ;;  %p454_p4 = pnand %p453_p3, %p447_p0 }
  0x13   :  { %267 = vmatprep.subr.mxu0 %v468_v4  ;;  %431 = vmatprep.subr.mxu1 %v468_v4  ;;  %v251_v40 = vld [vmem:[%s688_s6 + $0x80] sm:$0xff] }
  0x14   :  { %268 = vmatpush1.msra.mxu0 %v245_v24  ;;  %432 = vmatpush3.msra.mxu1 %v234_v33  ;;  %v214_v44 = vld [vmem:[%s690_s8] sm:$0x3] }
  0x15   :  { %269 = vmatprep.subr.mxu0 %v468_v4  ;;  %433 = vmatprep.subr.mxu1 %v468_v4  ;;  %v200_v46 = vld [vmem:[%s686_s4] sm:$0x3]  ;;  %vm215_vm2 = vcmp.gt.f32.partialorder %v214_v44, 0.5 }
  0x16   :  { %270 = vmatpush1.msra.mxu0 %v244_v25  ;;  %434 = vmatpush3.msra.mxu1 %v233_v35  ;;  %v205_v49 = vrot.slane %v200_v46, %v204_v45  ;;  %v218_v52 = vsel %vm215_vm2, 1, %v470_v51  ;;  %v209_v54 = vrot.slane %v200_v46, %v208_v47 }
  0x17   :  { %271 = vmatprep.subr.mxu0 %v468_v4  ;;  %435 = vmatprep.subr.mxu1 %v468_v4  ;;  %v226_v56 = vrot.slane %v218_v52, %v208_v47  ;;  %v222_v59 = vrot.slane %v218_v52, %v204_v45 }
  0x18   :  { %272 = vmatpush1.msra.mxu0 %v243_v26  ;;  %436 = vmatpush3.msra.mxu1 %v232_v37 }
  0x19   :  { %273 = vmatprep.subr.mxu0 %v468_v4  ;;  %437 = vmatprep.subr.mxu1 %v468_v4  ;;  %vm228_vm3 = vcmp.eq.s32.totalorder %v226_v56, 1  ;;  %vm227_vm5 = vcmp.eq.s32.totalorder %v222_v59, 1 }
  0x1a   :  { %274 = vmatpush1.msra.mxu0 %v242_v27  ;;  %438 = vmatpush3.msra.mxu1 %v231_v39 }
  0x1b   :  { %275 = vmatprep.subr.mxu0 %v468_v4  ;;  %439 = vmatprep.mubr.msk.f32.mxu1 %vm469_vm1, %v468_v4 }
  0x1c   :  { %276 = vmatpush1.msra.mxu0 %v241_v28  ;;  %440 = vmatmul.mubr.msk.f32.vlgmr.msra.gmra.mxu1 %vm51_vm0, %v33_v22 }
  0x1d   :  { %277 = vmatprep.subr.mxu0 %v468_v4 }
  0x1e   :  { %278 = vmatpush1.msra.mxu0 %v240_v29 }
  0x1f   :  { %279 = vmatprep.subr.mxu0 %v468_v4 }
  0x20   :  { %280 = vmatpush1.msra.mxu0 %v239_v30 }
  0x21   :  { %281 = vmatprep.subr.mxu0 %v468_v4 }
  0x22   :  { %282 = vmatpush1.msra.mxu0 %v238_v31 }
  0x23   :  { %283 = vmatprep.subr.mxu0 %v468_v4 }
  0x24   :  { %284 = vmatpush1.msra.mxu0 %v237_v32 }
  0x25   :  { %285 = vmatprep.subr.mxu0 %v468_v4 }
  0x26   :  { %286 = vmatpush1.msra.mxu0 %v236_v34 }
  0x27   :  { %287 = vmatprep.subr.mxu0 %v468_v4 }
  0x28   :  { %288 = vmatpush1.msra.mxu0 %v235_v36 }
  0x29   :  { %317 = vmatprep.subr.mxu0 %v468_v4 }
  0x2a   :  { %318 = vmatpush2.msra.mxu0 %v252_v38 }
  0x2b   :  { %319 = vmatprep.subr.mxu0 %v468_v4  ;;  %v425_v4 = vld [vmem:[%s689_s7] ss:$0 sm:$0xff] }
  0x2c   :  { %320 = vmatpush2.msra.mxu0 %v251_v40 }
  0xca   :  { %v121_v43 = vpop.f32.mrf.mxu1 }
  0xcc   :  { %v123_v48 = vpop.f32.mrf.mxu1 }
  0xd2   :  { %v195_v50 = vpop.f32.mrf.mxu1 }
  0xd3   :  { %v196_v53 = vadd.f32 %v195_v50, %v121_v43 }
  0xd4   :  { %v197_v55 = vpop.f32.mrf.mxu1 }
  0xd5   :  { %v212_v57 = vadd.f32 %v205_v49, %v196_v53  ;;  %v198_v58 = vadd.f32 %v197_v55, %v123_v48 }
  0xd7   :  { %v213_v60 = vadd.f32 %v209_v54, %v198_v58  ;;  %v216_v61 = vmax.f32 %v212_v57, 0.0 }
  0xd9   :  { %v217_v62 = vmax.f32 %v213_v60, 0.0  ;;  %v229_v0 = vsel %vm227_vm5, %v216_v61, %v212_v57 }
  0xdb   :  { %v230_v63 = vsel %vm228_vm3, %v217_v62, %v213_v60 }
  0xdc   :  { %423 = vmatprep.mubr.msk.f32.mxu0 %vm253_vm4, %v230_v63  ;;  %v393_v1 = vpop.f32.mrf.mxu1 }
  0xdd   :  { %322 = vmatmul.mubr.f32.vlgmr.msra.gmra.mxu0 %v229_v0 }
  0xde   :  { %v441_v2 = vpop.f32.mrf.mxu1 }
 0x19d   :  { %v323_v3 = vpop.f32.mrf.mxu0 }
 0x19e   :  { %v394_v5 = vadd.f32 %v393_v1, %v323_v3 }
 0x19f   :  { %v325_v6 = vpop.f32.mrf.mxu0 }
 0x1a0   :  { %v404_v7 = vadd.f32 %v425_v4, %v394_v5 }
 0x1a2   :  { %406 = vst.msk [vmem:[#allocation2] sm:$0x3] %vm405_vm6, %v404_v7 }
 0x1a3   :  { %457 = shalt.err (!%p454_p4)
}
 0x1a4   :  { %416 = dma.vmem_to_hbm [thread:$0]  %s414_s19, 32, %s691_s9, [#allocation3]  }
 0x1a5   :  { %466 = dma.done.wait [#allocation3], 32  }
 0x1a6   :  { %467 = vsyncadd [#allocation3], 4294967264 }
 0x1a7   :  { %420 = vsyncpa [#allocation3], 1 }

</bundles_post_ra>
